<compile_context>
chip_gen: v5e
topology: v5e:2x2
jax: 0.10.0
libtpu: 0.0.40
codegen_flags: <defaults>
</compile_context>

<pallas_src>
import numpy as np
import jax
import jax.numpy as jnp
from jax.experimental import pallas as pl
from jax.experimental.pallas import tpu as pltpu


# ---------------------------------------------------------------------------
# Deterministic parameter setup (mirrors gaussian_kernel in the PyTorch code)
# ---------------------------------------------------------------------------
def gaussian_kernel_np(kernel_size, sigma):
    """2-D normalized Gaussian (used by the pure-JAX reference)."""
    rng = range(-kernel_size // 2 + 1, kernel_size // 2 + 1)
    k = np.array(
        [[np.exp(-(x ** 2 + y ** 2) / (2 * sigma ** 2)) for x in rng] for y in rng],
        dtype=np.float32,
    )
    return k / k.sum()


def gaussian_taps_np(kernel_size, sigma):
    """1-D normalized taps; outer(g, g) == 2-D normalized kernel (separable)."""
    rng = range(-kernel_size // 2 + 1, kernel_size // 2 + 1)
    g = np.array([np.exp(-(t ** 2) / (2 * sigma ** 2)) for t in rng], dtype=np.float64)
    return g / g.sum()


def replicate_band_matrix(size, padded_size, taps):
    """Fold '1-D Gaussian correlation + replicate (edge) padding' into a dense
    banded operator M so that (M @ x)[y] = sum_i taps[i] * x[clamp(y+i-p)].

    Rows/cols >= `size` are zero, so lane/sublane zero-padding of the image
    never contaminates real pixels (and padded outputs stay exactly zero).
    """
    K = len(taps)
    p = K // 2
    M = np.zeros((padded_size, padded_size), dtype=np.float64)
    for y in range(size):
        for i in range(K):
            src = min(max(y + i - p, 0), size - 1)
            M[y, src] += taps[i]
    return M.astype(np.float32)


# ---------------------------------------------------------------------------
# Fused kernel: blur1 -> hf -> blur2(hf^2) -> weighted focal-stack reduction
#   conv1:  blur = Av @ x @ Ah        (replicate pad folded into Av / Ah)
#   conv2:  w    = Bv @ hf^2 @ Bh
# ---------------------------------------------------------------------------
def _fused_kernel(depth_ref, x_ref, av_ref, ah_ref, bv_ref, bh_ref,
                  aif_ref, dep_ref, den_ref):
    # depth_ref : SMEM (N,)        -- scalar prefetch
    # x_ref     : VMEM (1, Hp, Wp) -- image n (zero padded to lane/sublane dense)
    # av/bv     : VMEM (Hp, Hp)    -- vertical band operators (constant blocks)
    # ah/bh     : VMEM (Wp, Wp)    -- horizontal band operators (pre-transposed)
    # aif/dep   : VMEM (Hp, Wp)    -- resident output accumulators
    # den_ref   : VMEM (Hp, Wp)    -- resident accumulator scratch (sum of w)
    n = pl.program_id(0)

    @pl.when(n == 0)
    def _init():
        aif_ref[...] = jnp.zeros_like(aif_ref)
        dep_ref[...] = jnp.zeros_like(dep_ref)
        den_ref[...] = jnp.zeros_like(den_ref)

    hi = jax.lax.Precision.HIGHEST
    x = x_ref[0]                                                # (Hp, Wp)

    # ---- conv1 on the MXU (replicate-padded separable Gaussian blur) ----
    v = jnp.dot(av_ref[...], x, precision=hi, preferred_element_type=jnp.float32)
    blur = jnp.dot(v, ah_ref[...], precision=hi, preferred_element_type=jnp.float32)

    hf = x - blur                                               # (Hp, Wp)
    sq = hf * hf

    # ---- conv2 on the MXU (sharpness weight; pad(hf)^2 == pad(hf^2)) ----
    v2 = jnp.dot(bv_ref[...], sq, precision=hi, preferred_element_type=jnp.float32)
    w = jnp.dot(v2, bh_ref[...], precision=hi, preferred_element_type=jnp.float32)

    # ---- focal-stack reduction (accumulate directly into outputs) ----
    d = depth_ref[n]
    aif_ref[...] += w * hf
    dep_ref[...] += w * d
    den_ref[...] += w

    @pl.when(n == pl.num_programs(0) - 1)
    def _finalize():
        # Exact divide (runs once); matches the reference (no epsilon — flat
        # regions where hf == 0 for every n give Inf/NaN, same as PyTorch).
        inv = 1.0 / den_ref[...]
        aif_ref[...] = aif_ref[...] * inv
        dep_ref[...] = dep_ref[...] * inv


def _vmem_limit_bytes(Hp, Wp):
    f32 = 4
    need = f32 * (
        2 * Hp * Wp                    # double-buffered per-image input block
        + 4 * Hp * Wp                  # two resident output accumulators (+writeback)
        + Hp * Wp                      # den scratch
        + 2 * (Hp * Hp + Wp * Wp)      # band matrices (conservatively x2)
        + 6 * Hp * Wp                  # matmul intermediates / spill slack
    )
    # Cap well below *physical* VMEM (v7x has only 64 MiB per TensorCore).
    try:
        cap = int(0.75 * pltpu.get_tpu_info().vmem_capacity_bytes)
    except Exception:  # pragma: no cover - conservative fallback
        cap = 48 * 2 ** 20
    return int(min(cap, max(32 * 2 ** 20, 2 * need)))


# ---------------------------------------------------------------------------
# Wrapper (equivalent of LightField_AIF.forward)
# ---------------------------------------------------------------------------
def lightfield_aif_pallas(img, depth, sigma1, sigma2, truncate=4.0):
    # img:   (N, 1, H, W) float32   (focal stack of single-channel images)
    # depth: (N,)         float32   (focus depth per stack element)
    N, C, H, W = img.shape
    assert C == 1, "LightField_AIF uses single-channel conv (1x1xKxK, groups=1)"

    kernel_size1 = int(2 * truncate * sigma1 - 1)
    kernel_size2 = int(2 * truncate * sigma2 - 1)
    assert kernel_size1 % 2 == 1 and kernel_size2 % 2 == 1, (
        "even Gaussian kernel sizes are unsupported (they also break the "
        "PyTorch reference's shape math); pick sigma so 2*truncate*sigma-1 is odd")
    g1 = gaussian_taps_np(kernel_size1, sigma1)
    g2 = gaussian_taps_np(kernel_size2, sigma2)

    LANE, SUB = 128, 8
    Wp = ((W + LANE - 1) // LANE) * LANE     # lane-dense last dim
    Hp = ((H + SUB - 1) // SUB) * SUB        # sublane-dense second-to-last dim

    # Replicate pad + 1-D conv folded into dense banded operators (MXU food).
    av = jnp.asarray(replicate_band_matrix(H, Hp, g1))          # conv1 vertical
    ah = jnp.asarray(replicate_band_matrix(W, Wp, g1).T)        # conv1 horizontal
    bv = jnp.asarray(replicate_band_matrix(H, Hp, g2))          # conv2 vertical
    bh = jnp.asarray(replicate_band_matrix(W, Wp, g2).T)        # conv2 horizontal

    x = img[:, 0].astype(jnp.float32)                           # (N, H, W)
    # Zero pad to (Hp, Wp) for lane/sublane-dense stores; cropped after the
    # call.  No replicate pre-pad of the stack is needed any more.
    x = jnp.pad(x, ((0, 0), (0, Hp - H), (0, Wp - W)))          # (N, Hp, Wp)

    aif, dep = pl.pallas_call(
        _fused_kernel,
        out_shape=(
            jax.ShapeDtypeStruct((Hp, Wp), jnp.float32),
            jax.ShapeDtypeStruct((Hp, Wp), jnp.float32),
        ),
        grid_spec=pltpu.PrefetchScalarGridSpec(
            num_scalar_prefetch=1,                    # depth -> SMEM
            grid=(N,),
            in_specs=[
                pl.BlockSpec((1, Hp, Wp), lambda n, d: (n, 0, 0)),  # image n
                pl.BlockSpec((Hp, Hp), lambda n, d: (0, 0)),        # av (const)
                pl.BlockSpec((Wp, Wp), lambda n, d: (0, 0)),        # ah (const)
                pl.BlockSpec((Hp, Hp), lambda n, d: (0, 0)),        # bv (const)
                pl.BlockSpec((Wp, Wp), lambda n, d: (0, 0)),        # bh (const)
            ],
            out_specs=(
                pl.BlockSpec((Hp, Wp), lambda n, d: (0, 0)),        # resident accum
                pl.BlockSpec((Hp, Wp), lambda n, d: (0, 0)),        # resident accum
            ),
            scratch_shapes=[
                pltpu.VMEM((Hp, Wp), jnp.float32),                  # den
            ],
        ),
        compiler_params=pltpu.CompilerParams(
            dimension_semantics=("arbitrary",),       # reduction over the stack
            vmem_limit_bytes=_vmem_limit_bytes(Hp, Wp),
        ),
    )(depth.astype(jnp.float32), x, av, ah, bv, bh)

    # Crop the lane/sublane padding; match torch output shapes (1, H, W).
    return aif[None, :H, :W], dep[None, :H, :W]


# ---------------------------------------------------------------------------
# Pure-JAX reference (mirrors the PyTorch forward) for correctness checking
# ---------------------------------------------------------------------------
def lightfield_aif_ref(img, depth, sigma1, sigma2, truncate=4.0):
    N, C, H, W = img.shape
    kernel_size1 = int(2 * truncate * sigma1 - 1)
    kernel_size2 = int(2 * truncate * sigma2 - 1)
    p1 = kernel_size1 // 2
    p2 = kernel_size2 // 2
    k1 = jnp.asarray(gaussian_kernel_np(kernel_size1, sigma1))
    k2 = jnp.asarray(gaussian_kernel_np(kernel_size2, sigma2))

    def conv_valid(xpad, k):  # xpad: (N, Hp, Wp), k: (K, K)
        return jax.lax.conv_general_dilated(
            xpad[:, None], k[None, None], window_strides=(1, 1),
            padding="VALID",
            dimension_numbers=("NCHW", "OIHW", "NCHW"),
            precision=jax.lax.Precision.HIGHEST)[:, 0]

    x = img[:, 0]
    xpad = jnp.pad(x, ((0, 0), (p1, p1), (p1, p1)), mode="edge")
    blur = conv_valid(xpad, k1)
    hf = x - blur
    hfpad = jnp.pad(hf, ((0, 0), (p2, p2), (p2, p2)), mode="edge")
    w = conv_valid(hfpad ** 2, k2)
    den = w.sum(0)
    aif = (w * hf).sum(0) / den
    dep = (w * depth[:, None, None]).sum(0) / den
    return aif[None], dep[None]


if __name__ == "__main__":
    key = jax.random.PRNGKey(0)
    k_img, _ = jax.random.split(key)

    N, H, W = 4, 16, 16
    sigma1, sigma2 = 0.5, 1.0   # -> kernel sizes 3 and 7 (both odd)

    img = jax.random.uniform(k_img, (N, 1, H, W), dtype=jnp.float32)
    depth = jnp.linspace(0.5, 2.0, N).astype(jnp.float32)

    aif, dep = lightfield_aif_pallas(img, depth, sigma1, sigma2)
    jax.block_until_ready((aif, dep))

    aif_r, dep_r = lightfield_aif_ref(img, depth, sigma1, sigma2)
    assert aif.shape == (1, H, W) and dep.shape == (1, H, W)
    np.testing.assert_allclose(np.asarray(aif), np.asarray(aif_r), atol=1e-4, rtol=1e-4)
    np.testing.assert_allclose(np.asarray(dep), np.asarray(dep_r), atol=1e-4, rtol=1e-4)

    print("KERNEL_OK")
</pallas_src>

<mosaic_0001>
module attributes {stable_mosaic.version = 11 : i64} {
  func.func @_fused_kernel(%arg0: i32, %arg1: memref<4xf32, #tpu.memory_space<smem>>, %arg2: memref<1x16x128xf32, #tpu.memory_space<vmem>>, %arg3: memref<16x16xf32, #tpu.memory_space<vmem>>, %arg4: memref<128x128xf32, #tpu.memory_space<vmem>>, %arg5: memref<16x16xf32, #tpu.memory_space<vmem>>, %arg6: memref<128x128xf32, #tpu.memory_space<vmem>>, %arg7: memref<16x128xf32, #tpu.memory_space<vmem>>, %arg8: memref<16x128xf32, #tpu.memory_space<vmem>>, %arg9: memref<16x128xf32, #tpu.memory_space<vmem>>) attributes {dimension_semantics = [#tpu.dimension_semantics<arbitrary>], iteration_bounds = array<i64: 4>, scalar_prefetch = 1 : i64, scratch_operands = 1 : i64, tpu.core_type = #tpu.core_type<tc>, window_params = [{transform_indices = @transform_0, window_bounds = array<i64: 1, 16, 128>}, {pipeline_mode = #tpu.pipeline_mode<synchronous>, transform_indices = @transform_1, window_bounds = array<i64: 16, 16>}, {pipeline_mode = #tpu.pipeline_mode<synchronous>, transform_indices = @transform_2, window_bounds = array<i64: 128, 128>}, {pipeline_mode = #tpu.pipeline_mode<synchronous>, transform_indices = @transform_3, window_bounds = array<i64: 16, 16>}, {pipeline_mode = #tpu.pipeline_mode<synchronous>, transform_indices = @transform_4, window_bounds = array<i64: 128, 128>}, {pipeline_mode = #tpu.pipeline_mode<synchronous>, transform_indices = @transform_5, window_bounds = array<i64: 16, 128>}, {pipeline_mode = #tpu.pipeline_mode<synchronous>, transform_indices = @transform_6, window_bounds = array<i64: 16, 128>}]} {
    %c0_i32 = arith.constant 0 : i32
    %0 = arith.cmpi eq, %arg0, %c0_i32 : i32
    %1 = arith.extui %0 : i1 to i32
    %c0_i32_0 = arith.constant 0 : i32
    %2 = arith.cmpi ne, %1, %c0_i32_0 : i32
    scf.if %2 {
      %cst_27 = arith.constant 0.000000e+00 : f32
      %32 = vector.broadcast %cst_27 : f32 to vector<16x128xf32>
      %c0_28 = arith.constant 0 : index
      %c0_29 = arith.constant 0 : index
      %33 = vector.load %arg7[%c0_28, %c0_29] : memref<16x128xf32, #tpu.memory_space<vmem>>, vector<16x128xf32>
      tpu.vector_store %arg7[%c0_28, %c0_29], %32 {strides = array<i32>} : memref<16x128xf32, #tpu.memory_space<vmem>>, vector<16x128xf32>,
      %cst_30 = arith.constant 0.000000e+00 : f32
      %34 = vector.broadcast %cst_30 : f32 to vector<16x128xf32>
      %c0_31 = arith.constant 0 : index
      %c0_32 = arith.constant 0 : index
      %35 = vector.load %arg8[%c0_31, %c0_32] : memref<16x128xf32, #tpu.memory_space<vmem>>, vector<16x128xf32>
      tpu.vector_store %arg8[%c0_31, %c0_32], %34 {strides = array<i32>} : memref<16x128xf32, #tpu.memory_space<vmem>>, vector<16x128xf32>,
      %cst_33 = arith.constant 0.000000e+00 : f32
      %36 = vector.broadcast %cst_33 : f32 to vector<16x128xf32>
      %c0_34 = arith.constant 0 : index
      %c0_35 = arith.constant 0 : index
      %37 = vector.load %arg9[%c0_34, %c0_35] : memref<16x128xf32, #tpu.memory_space<vmem>>, vector<16x128xf32>
      tpu.vector_store %arg9[%c0_34, %c0_35], %36 {strides = array<i32>} : memref<16x128xf32, #tpu.memory_space<vmem>>, vector<16x128xf32>,
    } else {
    }
    %c0 = arith.constant 0 : index
    %c0_1 = arith.constant 0 : index
    %c0_2 = arith.constant 0 : index
    %3 = vector.load %arg2[%c0, %c0_1, %c0_2] : memref<1x16x128xf32, #tpu.memory_space<vmem>>, vector<1x16x128xf32>
    %4 = vector.shape_cast %3 : vector<1x16x128xf32> to vector<16x128xf32>
    %c0_3 = arith.constant 0 : index
    %c0_4 = arith.constant 0 : index
    %5 = vector.load %arg3[%c0_3, %c0_4] : memref<16x16xf32, #tpu.memory_space<vmem>>, vector<16x16xf32>
    %cst = arith.constant dense<0.000000e+00> : vector<16x128xf32>
    %6 = tpu.matmul %5, %4, %cst {dimension_numbers = #tpu.dot_dimension_numbers<[1], [0], [0], [1], [0, 0, 1, 1], [], []>, precision = #tpu.contract_precision<fp32>} : vector<16x16xf32>, vector<16x128xf32>, vector<16x128xf32> -> vector<16x128xf32>
    %c0_5 = arith.constant 0 : index
    %c0_6 = arith.constant 0 : index
    %7 = vector.load %arg4[%c0_5, %c0_6] : memref<128x128xf32, #tpu.memory_space<vmem>>, vector<128x128xf32>
    %cst_7 = arith.constant dense<0.000000e+00> : vector<16x128xf32>
    %8 = tpu.matmul %6, %7, %cst_7 {dimension_numbers = #tpu.dot_dimension_numbers<[1], [0], [0], [1], [0, 0, 1, 1], [], []>, precision = #tpu.contract_precision<fp32>} : vector<16x128xf32>, vector<128x128xf32>, vector<16x128xf32> -> vector<16x128xf32>
    %9 = arith.subf %4, %8 : vector<16x128xf32>
    %10 = arith.mulf %9, %9 : vector<16x128xf32>
    %c0_8 = arith.constant 0 : index
    %c0_9 = arith.constant 0 : index
    %11 = vector.load %arg5[%c0_8, %c0_9] : memref<16x16xf32, #tpu.memory_space<vmem>>, vector<16x16xf32>
    %cst_10 = arith.constant dense<0.000000e+00> : vector<16x128xf32>
    %12 = tpu.matmul %11, %10, %cst_10 {dimension_numbers = #tpu.dot_dimension_numbers<[1], [0], [0], [1], [0, 0, 1, 1], [], []>, precision = #tpu.contract_precision<fp32>} : vector<16x16xf32>, vector<16x128xf32>, vector<16x128xf32> -> vector<16x128xf32>
    %c0_11 = arith.constant 0 : index
    %c0_12 = arith.constant 0 : index
    %13 = vector.load %arg6[%c0_11, %c0_12] : memref<128x128xf32, #tpu.memory_space<vmem>>, vector<128x128xf32>
    %cst_13 = arith.constant dense<0.000000e+00> : vector<16x128xf32>
    %14 = tpu.matmul %12, %13, %cst_13 {dimension_numbers = #tpu.dot_dimension_numbers<[1], [0], [0], [1], [0, 0, 1, 1], [], []>, precision = #tpu.contract_precision<fp32>} : vector<16x128xf32>, vector<128x128xf32>, vector<16x128xf32> -> vector<16x128xf32>
    %15 = arith.index_cast %arg0 : i32 to index
    %16 = memref.load %arg1[%15] : memref<4xf32, #tpu.memory_space<smem>>
    %c0_14 = arith.constant 0 : index
    %c0_15 = arith.constant 0 : index
    %17 = vector.load %arg7[%c0_14, %c0_15] : memref<16x128xf32, #tpu.memory_space<vmem>>, vector<16x128xf32>
    %18 = arith.mulf %14, %9 : vector<16x128xf32>
    %19 = arith.addf %17, %18 : vector<16x128xf32>
    %c0_16 = arith.constant 0 : index
    %c0_17 = arith.constant 0 : index
    %20 = vector.load %arg7[%c0_16, %c0_17] : memref<16x128xf32, #tpu.memory_space<vmem>>, vector<16x128xf32>
    tpu.vector_store %arg7[%c0_16, %c0_17], %19 {strides = array<i32>} : memref<16x128xf32, #tpu.memory_space<vmem>>, vector<16x128xf32>,
    %c0_18 = arith.constant 0 : index
    %c0_19 = arith.constant 0 : index
    %21 = vector.load %arg8[%c0_18, %c0_19] : memref<16x128xf32, #tpu.memory_space<vmem>>, vector<16x128xf32>
    %22 = vector.broadcast %16 : f32 to vector<16x128xf32>
    %23 = arith.mulf %14, %22 : vector<16x128xf32>
    %24 = arith.addf %21, %23 : vector<16x128xf32>
    %c0_20 = arith.constant 0 : index
    %c0_21 = arith.constant 0 : index
    %25 = vector.load %arg8[%c0_20, %c0_21] : memref<16x128xf32, #tpu.memory_space<vmem>>, vector<16x128xf32>
    tpu.vector_store %arg8[%c0_20, %c0_21], %24 {strides = array<i32>} : memref<16x128xf32, #tpu.memory_space<vmem>>, vector<16x128xf32>,
    %c0_22 = arith.constant 0 : index
    %c0_23 = arith.constant 0 : index
    %26 = vector.load %arg9[%c0_22, %c0_23] : memref<16x128xf32, #tpu.memory_space<vmem>>, vector<16x128xf32>
    %27 = arith.addf %26, %14 : vector<16x128xf32>
    %c0_24 = arith.constant 0 : index
    %c0_25 = arith.constant 0 : index
    %28 = vector.load %arg9[%c0_24, %c0_25] : memref<16x128xf32, #tpu.memory_space<vmem>>, vector<16x128xf32>
    tpu.vector_store %arg9[%c0_24, %c0_25], %27 {strides = array<i32>} : memref<16x128xf32, #tpu.memory_space<vmem>>, vector<16x128xf32>,
    %c3_i32 = arith.constant 3 : i32
    %29 = arith.cmpi eq, %arg0, %c3_i32 : i32
    %30 = arith.extui %29 : i1 to i32
    %c0_i32_26 = arith.constant 0 : i32
    %31 = arith.cmpi ne, %30, %c0_i32_26 : i32
    scf.if %31 {
      %c0_27 = arith.constant 0 : index
      %c0_28 = arith.constant 0 : index
      %32 = vector.load %arg9[%c0_27, %c0_28] : memref<16x128xf32, #tpu.memory_space<vmem>>, vector<16x128xf32>
      %cst_29 = arith.constant 1.000000e+00 : f32
      %33 = vector.broadcast %cst_29 : f32 to vector<16x128xf32>
      %34 = arith.divf %33, %32 : vector<16x128xf32>
      %c0_30 = arith.constant 0 : index
      %c0_31 = arith.constant 0 : index
      %35 = vector.load %arg7[%c0_30, %c0_31] : memref<16x128xf32, #tpu.memory_space<vmem>>, vector<16x128xf32>
      %36 = arith.mulf %35, %34 : vector<16x128xf32>
      %c0_32 = arith.constant 0 : index
      %c0_33 = arith.constant 0 : index
      %37 = vector.load %arg7[%c0_32, %c0_33] : memref<16x128xf32, #tpu.memory_space<vmem>>, vector<16x128xf32>
      tpu.vector_store %arg7[%c0_32, %c0_33], %36 {strides = array<i32>} : memref<16x128xf32, #tpu.memory_space<vmem>>, vector<16x128xf32>,
      %c0_34 = arith.constant 0 : index
      %c0_35 = arith.constant 0 : index
      %38 = vector.load %arg8[%c0_34, %c0_35] : memref<16x128xf32, #tpu.memory_space<vmem>>, vector<16x128xf32>
      %39 = arith.mulf %38, %34 : vector<16x128xf32>
      %c0_36 = arith.constant 0 : index
      %c0_37 = arith.constant 0 : index
      %40 = vector.load %arg8[%c0_36, %c0_37] : memref<16x128xf32, #tpu.memory_space<vmem>>, vector<16x128xf32>
      tpu.vector_store %arg8[%c0_36, %c0_37], %39 {strides = array<i32>} : memref<16x128xf32, #tpu.memory_space<vmem>>, vector<16x128xf32>,
    } else {
    }
    return
  }
  func.func @transform_0(%arg0: i32, %arg1: memref<4xf32, #tpu.memory_space<smem>>) -> (i32, i32, i32) {
    %c0_i32 = arith.constant 0 : i32
    %c0_i32_0 = arith.constant 0 : i32
    %c0_i32_1 = arith.constant 0 : i32
    return %arg0, %c0_i32, %c0_i32_0 : i32, i32, i32
  }
  func.func @transform_1(%arg0: i32, %arg1: memref<4xf32, #tpu.memory_space<smem>>) -> (i32, i32) {
    %c0_i32 = arith.constant 0 : i32
    %c0_i32_0 = arith.constant 0 : i32
    %c0_i32_1 = arith.constant 0 : i32
    return %c0_i32, %c0_i32_0 : i32, i32
  }
  func.func @transform_2(%arg0: i32, %arg1: memref<4xf32, #tpu.memory_space<smem>>) -> (i32, i32) {
    %c0_i32 = arith.constant 0 : i32
    %c0_i32_0 = arith.constant 0 : i32
    %c0_i32_1 = arith.constant 0 : i32
    return %c0_i32, %c0_i32_0 : i32, i32
  }
  func.func @transform_3(%arg0: i32, %arg1: memref<4xf32, #tpu.memory_space<smem>>) -> (i32, i32) {
    %c0_i32 = arith.constant 0 : i32
    %c0_i32_0 = arith.constant 0 : i32
    %c0_i32_1 = arith.constant 0 : i32
    return %c0_i32, %c0_i32_0 : i32, i32
  }
  func.func @transform_4(%arg0: i32, %arg1: memref<4xf32, #tpu.memory_space<smem>>) -> (i32, i32) {
    %c0_i32 = arith.constant 0 : i32
    %c0_i32_0 = arith.constant 0 : i32
    %c0_i32_1 = arith.constant 0 : i32
    return %c0_i32, %c0_i32_0 : i32, i32
  }
  func.func @transform_5(%arg0: i32, %arg1: memref<4xf32, #tpu.memory_space<smem>>) -> (i32, i32) {
    %c0_i32 = arith.constant 0 : i32
    %c0_i32_0 = arith.constant 0 : i32
    %c0_i32_1 = arith.constant 0 : i32
    return %c0_i32, %c0_i32_0 : i32, i32
  }
  func.func @transform_6(%arg0: i32, %arg1: memref<4xf32, #tpu.memory_space<smem>>) -> (i32, i32) {
    %c0_i32 = arith.constant 0 : i32
    %c0_i32_0 = arith.constant 0 : i32
    %c0_i32_1 = arith.constant 0 : i32
    return %c0_i32, %c0_i32_0 : i32, i32
  }
}

</mosaic_0001>

<bundles_post_ra>
// kernel: tpu_custom_call.1
= control target key start
LH: loop header
LB: loop body
LE: loop exit
PB: predicated region body
PF: predicated region fallthrough
CT: control target
= control target key end

     0   :  { %s2121_s27 = smov [#allocation4]   ;;  %s2839_s0 = inlined_call_operand.hbm [shape: f32[4], index: 0, kind: input, shape index: {}]   ;;  %s2840_s1 = inlined_call_operand.hbm [shape: f32[4,16,128], index: 1, kind: input, shape index: {}]   ;;  %s2841_s2 = inlined_call_operand.hbm [shape: f32[16,16], index: 2, kind: input, shape index: {}]   ;;  %s2842_s3 = inlined_call_operand.hbm [shape: f32[128,128], index: 3, kind: input, shape index: {}]   ;;  %s2843_s4 = inlined_call_operand.hbm [shape: f32[16,16], index: 4, kind: input, shape index: {}]   ;;  %s2844_s5 = inlined_call_operand.hbm [shape: f32[128,128], index: 5, kind: input, shape index: {}]   ;;  %s2845_s6 = inlined_call_operand.hbm [shape: f32[16,128], index: 6, kind: output, shape index: {0}]   ;;  %s2846_s7 = inlined_call_operand.hbm [shape: f32[16,128], index: 7, kind: output, shape index: {1}]  }
   0x1   :  { %s14_s26 = sshll.u32 %s2839_s0, 4  ;;  %s15_s26 = int_to_ptr.hbm [resolvable:$true] %s14_s26 }
   0x2   :  { %17 = dma.hbm_to_smem %s15_s26, 16, %s2121_s27, [#allocation3] }
   0x3   :  { %2083 = dma.done.wait [#allocation3], 16 }
   0x4   :  { %2084 = vsyncadd [#allocation3], 4294967280 }
   0x5   :  { %20 = sfence }
   0x6   :  { %21 = vsyncpa [#allocation6], 0 }
   0x7   :  { %23 = vsyncpa [#allocation6 + $0x1], 0 }
   0x8   :  { %24 = vsyncpa [#allocation9], 0 }
   0x9   :  { %25 = vsyncpa [#allocation12], 0 }
   0xa   :  { %26 = vsyncpa [#allocation7], 0 }
   0xb   :  { %27 = vsyncpa [#allocation16], 0  ;;  %s2176_s28 = smov 0   ;;  %s2178_s29 = smov 0  }
   0xc   :  { %s2180_s30 = smov 0   ;;  %s2182_s8 = smov 0  }
   0xd LB: > { %s2195_s0 = sadd.s32 4294967295, %s2119_s8   ;;  %p53_p0 = scmp.ne.s32.totalorder %s2111_s29, %s2107_s28  ;;  %s2119_s8 = sphi %s2182_s8, %s2854_s8   ;;  %s2115_s30 = sphi %s2180_s30, %s2853_s30   ;;  %s2111_s29 = sphi %s2178_s29, %s2852_s29   ;;  %s2107_s28 = sphi %s2176_s28, %s2851_s28  }
   0xe   : > { %p54_p1 = scmp.eq.s32.totalorder %s2195_s0, 0  ;;  %p1721_p2 = scmp.ge.s32.totalorder %s2119_s8, 1 }
   0xf   : > { %p190_p3 = scmp.lt.s32.totalorder %s2119_s8, 5  ;;  %p1722_p4 = scmp.ne.s32.totalorder %s2195_s0, 0 }
  0x10   : > { %p2204_p5 = por %p54_p1, %p53_p0  ;;  %s201_s12 = sshll.u32 %s2841_s2, 4  ;;  %s202_s12 = int_to_ptr.hbm [resolvable:$true] %s201_s12 }
  0x11   : > { %p2211_p6 = pnand %p1721_p2, %p190_p3  ;;  %s2122_s14 = smov [#allocation8]  }
  0x12   : > { %s203_s15 = sshll.u32 %s2122_s14, 4  ;;  %s229_s19 = sshll.u32 %s2843_s4, 4  ;;  %s204_s15 = int_to_ptr.vmem [resolvable:$true] %s203_s15  ;;  %s230_s19 = int_to_ptr.hbm [resolvable:$true] %s229_s19 }
  0x13   : > { %p1771_p7 = pneg %p2211_p6  ;;  %s2123_s20 = smov 128  }
  0x14   : > { %s2124_s21 = smov 8   ;;  %s2125_s22 = smov [#allocation11]  }
  0x15   : > { %p2219_p8 = pnand %p1771_p7, %p54_p1  ;;  %s231_s23 = sshll.u32 %s2125_s22, 4  ;;  %s232_s23 = int_to_ptr.vmem [resolvable:$true] %s231_s23 }
  0x16   : > { %s215_s26 = sshll.u32 %s2842_s3, 4  ;;  %s243_s10 = sshll.u32 %s2844_s5, 4  ;;  %s216_s26 = int_to_ptr.hbm [resolvable:$true] %s215_s26  ;;  %s244_s10 = int_to_ptr.hbm [resolvable:$true] %s243_s10 }
  0x17   : > { %1774 = dma.hbm_to_vmem [thread:$0]  (!%p2219_p8), %s202_s12, 256, %s204_s15, [#allocation9], %s2123_s20, %s2123_s20, %s2124_s21  }
  0x18   : > { %1780 = dma.hbm_to_vmem [thread:$0]  (!%p2219_p8), %s230_s19, 256, %s232_s23, [#allocation12], %s2123_s20, %s2123_s20, %s2124_s21  }
  0x19   : > { %s2126_s11 = smov [#allocation10]   ;;  %s2127_s14 = smov [#allocation13]  }
  0x1a   : > { %s217_s12 = sshll.u32 %s2126_s11, 4  ;;  %s245_s15 = sshll.u32 %s2127_s14, 4  ;;  %s218_s12 = int_to_ptr.vmem [resolvable:$true] %s217_s12  ;;  %s246_s15 = int_to_ptr.vmem [resolvable:$true] %s245_s15 }
  0x1b   : > { %1777 = dma.hbm_to_vmem [thread:$0]  (!%p2219_p8), %s216_s26, 2048, %s218_s12, [#allocation9], %s2123_s20, %s2123_s20, %s2124_s21  }
  0x1c   : > { %1783 = dma.hbm_to_vmem [thread:$0]  (!%p2219_p8), %s244_s10, 2048, %s246_s15, [#allocation12], %s2123_s20, %s2123_s20, %s2124_s21  }
  0x1d   : > { %s2253_s17 = sadd.s32 1, %s2119_s8   ;;  %s40_s18 = sadd.s32 1, %s2115_s30 }
  0x1e   : > { %s37_s19 = ssub.s32 %s2119_s8, %s2253_s17  ;;  %p47_p9 = scmp.ne.s32.totalorder %s2115_s30, %s2111_s29 }
  0x1f   : > { %p38_p10 = scmp.eq.s32.totalorder %s37_s19, 0  ;;  %p48_p11 = scmp.eq.s32.totalorder %s2119_s8, 0 }
  0x20   : > { %s259_s22 = sand.u32 1, %s2115_s30   ;;  %p1792_p13 = scmp.lt.s32.totalorder %s2119_s8, 4 }
  0x21   : > { %s2263_s23 = scalar_select %p38_p10, %s2115_s30, %s40_s18  }
  0x22   : > { %p49_p12 = por %p48_p11, %p47_p9  ;;  %s1727_s24 = sshll.u32 %s259_s22, 4 }
  0x23   : > { %s1744_s25 = sshll.u32 %s2119_s8, 4  ;;  %s263_s10 = scalar_lea.vmem [#allocation5], %s1727_s24 }
  0x24   : > { %s268_s27 = scalar_lea.hbm %s2840_s1, %s1744_s25  ;;  %s271_s11 = sshll.u32 %s263_s10, 4  ;;  %s272_s11 = int_to_ptr.vmem [resolvable:$true] %s271_s11 }
  0x25   : > { %s269_s28 = sshll.u32 %s268_s27, 4  ;;  %p2270_p0 = pnand %p1792_p13, %p49_p12  ;;  %s270_s28 = int_to_ptr.hbm [resolvable:$true] %s269_s28 }
  0x26   : > { %s260_s14 = scalar_lea.sflag [#allocation6], %s259_s22  ;;  %s1981_s15 = sshra.s32 %s270_s28, 4  ;;  %s1982_s15 = int_to_ptr.hbm [resolvable:$true] %s1981_s15 }
  0x27   : > { %s1983_s18 = scalar_lea.hbm %s1982_s15, 16  ;;  %p1985_p3 = pneg %p2270_p0 }
  0x28   : > { %p1984_p2 = scmp.ne.s32.totalorder %s1982_s15, %s1983_s18  ;;  %s1988_s24 = scalar_lea.hbm %s2840_s1, 64 }
  0x29   : > { %p1989_p9 = scmp.lt.s32.totalorder %s1982_s15, %s2840_s1  ;;  %p1990_p10 = scmp.lt.s32.totalorder %s1988_s24, %s1983_s18 }
  0x2a   : > { %p1986_p7 = pnand %p1985_p3, %p1984_p2 }
  0x2b   : > { %p1991_p11 = por %p1990_p10, %p1989_p9 }
  0x2c   : > { %p1987_p8 = pneg %p1986_p7 }
  0x2e   : > { %p1992_p12 = pnand %p1991_p11, %p1987_p8 }
  0x30   : > { %1995 = shalt.err (!%p1992_p12)
}
  0x31   : > { %1787 = dma.hbm_to_vmem [thread:$0]  (!%p2270_p0), %s270_s28, 256, %s272_s11, %s260_s14, %s2123_s20, %s2123_s20, %s2124_s21  }
  0x32   : > { %283 = sbr.rel (%p2211_p6) target bundleno = 782 (0x30e), region = 40  ;;  %s285_s22 = sand.u32 (!%p2211_p6), 1, %s2111_s29  }
  0x33   : > { %s1731_s26 = sshll.u32 (!%p2211_p6), %s285_s22, 4  ;;  %s286_s27 = scalar_lea.sflag (!%p2211_p6), [#allocation6], %s285_s22 }
  0x34   : > { %s289_s10 = scalar_lea.vmem (!%p2211_p6), [#allocation5], %s1731_s26 }
  0x37   : > { %2086 = dma.done.wait (%p2204_p5), %s286_s27, 256  }
  0x38   : > { %2088 = vsyncadd (%p2204_p5), %s286_s27, 4294967040 }
  0x39   : > { %2090 = dma.done.wait (%p54_p1), [#allocation9], 2304  }
  0x3a   : > { %2092 = vsyncadd (%p54_p1), [#allocation9], 4294964992 }
  0x3b   : > { %2094 = dma.done.wait (%p54_p1), [#allocation12], 2304  }
  0x3c   : > { %2096 = vsyncadd (%p54_p1), [#allocation12], 4294964992  ;;  %337 = sbr.rel (%p1722_p4) target bundleno = 72 (0x48), region = 64 }
  0x41   : > { %v2128_v0 = vmov 0.0  }
  0x42   : > { %338 = vst [vmem:[#allocation14] sm:$0xff] %v2128_v0 }
  0x43   : > { %339 = vst [vmem:[#allocation14 + $0x8] sm:$0xff] %v2128_v0 }
  0x44   : > { %340 = vst [vmem:[#allocation15] sm:$0xff] %v2128_v0 }
  0x45   : > { %341 = vst [vmem:[#allocation15 + $0x8] sm:$0xff] %v2128_v0 }
  0x46   : > { %342 = vst [vmem:[#allocation2] sm:$0xff] %v2128_v0 }
  0x47   : > { %343 = vst [vmem:[#allocation2 + $0x8] sm:$0xff] %v2128_v0 }
  0x48 PF: > { %v2304_v1 = vld [vmem:[%s289_s10 + $0x8] sm:$0xff]  ;;  %v2306_v2 = vld [vmem:[%s289_s10] sm:$0xff]  ;;  %vm348_vm0 = vcmask 130048   ;;  %s2801_s9 = sld [smem:[#allocation4 + %s2195_s0]]  ;;  %p1737_p1 = scmp.ne.s32.totalorder %s2195_s0, 3 }
  0x49   : > { %v346_v3 = vld [vmem:[#allocation8] sm:$0xff]  ;;  %v2309_v4 = vand.u32 4294901760, %v2304_v1  ;;  %v2312_v5 = vand.u32 4294901760, %v2306_v2  ;;  %v347_v7 = vld [vmem:[#allocation8 + $0x8] sm:$0xff]  ;;  %v558_v20 = vld [vmem:[#allocation10 + $0x68] sm:$0xff] }
  0x4a   : > { %v350_v6 = vsel %vm348_vm0, %v346_v3, 0  ;;  %v353_v9 = vsel %vm348_vm0, %v347_v7, 0  ;;  %v560_v18 = vld [vmem:[#allocation10 + $0x78] sm:$0xff]  ;;  %v559_v19 = vld [vmem:[#allocation10 + $0x70] sm:$0xff]  ;;  %v557_v25 = vld [vmem:[#allocation10 + $0x60] sm:$0xff]  ;;  %v2340_v28 = vand.u32 4294901760, %v558_v20 }
  0x4b   : > { %v373_v8 = vand.u32 4294901760, %v350_v6  ;;  %370 = vmatpush.msra.mxu2 %v2309_v4  ;;  %v405_v10 = vsub.f32 %v2304_v1, %v2309_v4  ;;  %v411_v11 = vsub.f32 %v2306_v2, %v2312_v5  ;;  %v2321_v12 = vand.u32 4294901760, %v353_v9  ;;  %533 = vmatpush.msra.mxu1 %v2309_v4  ;;  %v556_v30 = vld [vmem:[#allocation10 + $0x58] sm:$0xff]  ;;  %v555_v31 = vld [vmem:[#allocation10 + $0x50] sm:$0xff]  ;;  %v554_v35 = vld [vmem:[#allocation10 + $0x48] sm:$0xff] }
  0x4c   : > { %v2333_v24 = vand.u32 4294901760, %v560_v18  ;;  %v2338_v27 = vand.u32 4294901760, %v559_v19  ;;  %v2342_v29 = vand.u32 4294901760, %v557_v25  ;;  %v2352_v38 = vsub.f32 %v558_v20, %v2340_v28  ;;  %v553_v40 = vld [vmem:[#allocation10 + $0x40] sm:$0xff]  ;;  %v552_v49 = vld [vmem:[#allocation10 + $0x38] sm:$0xff]  ;;  %v551_v60 = vld [vmem:[#allocation10 + $0x30] sm:$0xff] }
  0x4d   : > { %v2324_v13 = vsub.f32 %v350_v6, %v373_v8  ;;  %372 = vmatpush.msra.mxu2 %v2312_v5  ;;  %v406_v14 = vand.u32 4294901760, %v405_v10  ;;  %v412_v15 = vand.u32 4294901760, %v411_v11  ;;  %v2328_v16 = vsub.f32 %v353_v9, %v2321_v12  ;;  %535 = vmatpush.msra.mxu1 %v2312_v5 }
  0x4e   : > { %537 = vmatmul.f32.vlgmr.msra.gmra.mxu1 %v373_v8  ;;  %v2345_v34 = vsub.f32 %v560_v18, %v2333_v24  ;;  %v2349_v37 = vsub.f32 %v559_v19, %v2338_v27  ;;  %v2355_v39 = vsub.f32 %v557_v25, %v2342_v29  ;;  %v2361_v43 = vand.u32 4294901760, %v556_v30 }
  0x4f   : > { %v375_v17 = vand.u32 4294901760, %v2324_v13  ;;  %441 = vmatpush.msrb.mxu2 %v405_v10  ;;  %v407_v21 = vsub.f32 %v405_v10, %v406_v14  ;;  %v413_v22 = vsub.f32 %v411_v11, %v412_v15  ;;  %v383_v23 = vand.u32 4294901760, %v2328_v16  ;;  %504 = vmatpush.msra.mxu0 %v406_v14 }
  0x50   : > { %775 = vmatpush.msrb.mxu1 %v2333_v24  ;;  %v612_v42 = vand.u32 4294901760, %v2345_v34  ;;  %v2363_v44 = vand.u32 4294901760, %v555_v31  ;;  %v618_v45 = vand.u32 4294901760, %v2349_v37  ;;  %v624_v46 = vand.u32 4294901760, %v2352_v38 }
  0x51   : > { %v376_v26 = vsub.f32 %v2324_v13, %v375_v17  ;;  %444 = vmatpush.msrb.mxu2 %v411_v11  ;;  %v408_v32 = vand.u32 4294901760, %v407_v21  ;;  %v414_v33 = vand.u32 4294901760, %v413_v22  ;;  %508 = vmatpush.msra.mxu0 %v412_v15  ;;  %v384_v41 = vsub.f32 %v2328_v16, %v383_v23 }
  0x52   : > { %510 = vmatmul.f32.vlgmr.msra.gmra.mxu0 %v373_v8  ;;  %v630_v47 = vand.u32 4294901760, %v2355_v39  ;;  %v2369_v48 = vand.u32 4294901760, %v554_v35  ;;  %777 = vmatpush.msrb.mxu1 %v2338_v27  ;;  %v613_v50 = vsub.f32 %v2345_v34, %v612_v42  ;;  %v2377_v51 = vsub.f32 %v556_v30, %v2361_v43 }
  0x53   : > { %v377_v36 = vand.u32 4294901760, %v376_v26  ;;  %409 = vmatpush.msra.mxu3 %v408_v32  ;;  %717 = vmatpush.msrb.mxu0 %v2345_v34  ;;  %v2380_v52 = vsub.f32 %v555_v31, %v2363_v44  ;;  %v2382_v53 = vand.u32 4294901760, %v553_v40  ;;  %v619_v54 = vsub.f32 %v2349_v37, %v618_v45 }
  0x54   : > { %v625_v55 = vsub.f32 %v2352_v38, %v624_v46  ;;  %v614_v56 = vand.u32 4294901760, %v613_v50  ;;  %v636_v57 = vand.u32 4294901760, %v2377_v51  ;;  %v2395_v58 = vsub.f32 %v554_v35, %v2369_v48  ;;  %779 = vmatpush.msrb.mxu1 %v2340_v28 }
  0x55   : > { %378 = vmatmul.f32.vlgmr.msra.gmra.mxu2 %v377_v36  ;;  %415 = vmatpush.msra.mxu3 %v414_v33  ;;  %v2397_v59 = vand.u32 4294901760, %v552_v49  ;;  %v385_v61 = vand.u32 4294901760, %v384_v41  ;;  %v620_v62 = vand.u32 4294901760, %v619_v54  ;;  %v631_v63 = vsub.f32 %v2355_v39, %v630_v47  ;;  %v549_v33 = vld [vmem:[#allocation10 + $0x20] sm:$0xff] }
  0x56   : > { %562 = vmatpush.msra.mxu2 %v2333_v24  ;;  %417 = vmatmul.f32.vlgmr.msra.gmra.mxu3 %v373_v8  ;;  %v642_v0 = vand.u32 4294901760, %v2380_v52  ;;  %v2408_v3 = vsub.f32 %v553_v40, %v2382_v53  ;;  %v626_v6 = vand.u32 4294901760, %v625_v55  ;;  %v648_v7 = vand.u32 4294901760, %v2395_v58  ;;  %v548_v40 = vld [vmem:[#allocation10 + $0x18] sm:$0xff] }
  0x57   : > { %541 = vmatmul.f32.gmra.mxu1 %v2321_v12  ;;  %471 = vmatpush.msrb.mxu3 %v2309_v4  ;;  %v2411_v4 = vand.u32 4294901760, %v551_v60  ;;  %v2419_v8 = vsub.f32 %v552_v49, %v2397_v59  ;;  %v632_v9 = vand.u32 4294901760, %v631_v63  ;;  %v2475_v36 = vand.u32 4294901760, %v549_v33  ;;  %v547_v49 = vld [vmem:[#allocation10 + $0x10] sm:$0xff] }
  0x58   : > { %564 = vmatpush.msra.mxu2 %v2338_v27  ;;  %720 = vmatpush.msrb.mxu0 %v2349_v37  ;;  %v643_v10 = vsub.f32 %v2380_v52, %v642_v0  ;;  %v654_v11 = vand.u32 4294901760, %v2408_v3  ;;  %v649_v18 = vsub.f32 %v2395_v58, %v648_v7 }
  0x59   : > { %473 = vmatpush.msrb.mxu3 %v2312_v5  ;;  %v637_v5 = vsub.f32 %v2377_v51, %v636_v57  ;;  %v2428_v14 = vsub.f32 %v551_v60, %v2411_v4  ;;  %781 = vmatpush.msrb.mxu1 %v2342_v29  ;;  %v660_v19 = vand.u32 4294901760, %v2419_v8  ;;  %v546_v60 = vld [vmem:[#allocation10 + $0x8] sm:$0xff] }
  0x5a   : > { %566 = vmatpush.msra.mxu2 %v2340_v28  ;;  %514 = vmatmul.f32.gmra.mxu0 %v2321_v12  ;;  %v644_v20 = vand.u32 4294901760, %v643_v10  ;;  %v650_v22 = vand.u32 4294901760, %v649_v18 }
  0x5b   : > { %615 = vmatpush.msra.mxu3 %v614_v56  ;;  %723 = vmatpush.msrb.mxu0 %v2352_v38  ;;  %v638_v15 = vand.u32 4294901760, %v637_v5  ;;  %v666_v21 = vand.u32 4294901760, %v2428_v14  ;;  %v661_v25 = vsub.f32 %v2419_v8, %v660_v19  ;;  %v2495_v56 = vand.u32 4294901760, %v547_v49 }
  0x5c   : > { %568 = vmatpush.msra.mxu2 %v2342_v29  ;;  %783 = vmatpush.msrb.mxu1 %v2361_v43  ;;  %v2505_v5 = vand.u32 4294901760, %v546_v60 }
  0x5d   : > { %386 = vmatmul.f32.gmra.mxu2 %v385_v61  ;;  %621 = vmatpush.msra.mxu3 %v620_v62  ;;  %v667_v30 = vsub.f32 %v2428_v14, %v666_v21  ;;  %v662_v31 = vand.u32 4294901760, %v661_v25 }
  0x5e   : > { %570 = vmatpush.msra.mxu2 %v2361_v43  ;;  %726 = vmatpush.msrb.mxu0 %v2355_v39 }
  0x5f   : > { %421 = vmatmul.f32.gmra.mxu3 %v2321_v12  ;;  %v655_v12 = vsub.f32 %v2408_v3, %v654_v11  ;;  %785 = vmatpush.msrb.mxu1 %v2363_v44  ;;  %v668_v32 = vand.u32 4294901760, %v667_v30 }
  0x60   : > { %627 = vmatpush.msra.mxu3 %v626_v6  ;;  %572 = vmatpush.msra.mxu2 %v2363_v44  ;;  %v689_v6 = vsub.f32 %v547_v49, %v2495_v56 }
  0x61   : > { %729 = vmatpush.msrb.mxu0 %v2377_v51  ;;  %v656_v26 = vand.u32 4294901760, %v655_v12  ;;  %787 = vmatpush.msrb.mxu1 %v2369_v48  ;;  %v695_v12 = vsub.f32 %v546_v60, %v2505_v5  ;;  %v937_v60 = vld [vmem:[#allocation11] sm:$0xff] }
  0x62   : > { %633 = vmatpush.msra.mxu3 %v632_v9  ;;  %574 = vmatpush.msra.mxu2 %v2369_v48  ;;  %v545_v9 = vld [vmem:[#allocation10] sm:$0xff]  ;;  %v690_v18 = vand.u32 4294901760, %v689_v6 }
  0x63   : > { %732 = vmatpush.msrb.mxu0 %v2380_v52  ;;  %789 = vmatpush.msrb.mxu1 %v2382_v53  ;;  %v696_v30 = vand.u32 4294901760, %v695_v12 }
  0x64   : > { %639 = vmatpush.msra.mxu3 %v638_v15  ;;  %576 = vmatpush.msra.mxu2 %v2382_v53  ;;  %v691_v25 = vsub.f32 %v689_v6, %v690_v18 }
  0x65   : > { %447 = vmatmul.f32.vlgmr.msrb.gmra.mxu2 %v2324_v13  ;;  %735 = vmatpush.msrb.mxu0 %v2395_v58  ;;  %v550_v13 = vld [vmem:[#allocation10 + $0x28] sm:$0xff] }
  0x66   : > { %645 = vmatpush.msra.mxu3 %v644_v20  ;;  %578 = vmatpush.msra.mxu2 %v2397_v59  ;;  %v591_v20 = vand.u32 4294901760, %v545_v9 }
  0x67   : > { %477 = vmatmul.f32.vlgmr.msrb.gmra.mxu3 %v375_v17  ;;  %738 = vmatpush.msrb.mxu0 %v2408_v3  ;;  %v2470_v17 = vand.u32 4294901760, %v550_v13 }
  0x68   : > { %651 = vmatpush.msra.mxu3 %v650_v22  ;;  %580 = vmatpush.msra.mxu2 %v2411_v4 }
  0x69   : > { %741 = vmatpush.msrb.mxu0 %v2419_v8  ;;  %791 = vmatpush.msrb.mxu1 %v2397_v59  ;;  %v2473_v35 = vsub.f32 %v550_v13, %v2470_v17  ;;  %v697_v13 = vsub.f32 %v695_v12, %v696_v30 }
  0x6a   : > { %657 = vmatpush.msra.mxu3 %v656_v26  ;;  %582 = vmatpush.msra.mxu2 %v2470_v17  ;;  %v701_v26 = vsub.f32 %v545_v9, %v591_v20 }
  0x6b   : > { %744 = vmatpush.msrb.mxu0 %v2428_v14  ;;  %793 = vmatpush.msrb.mxu1 %v2411_v4  ;;  %v672_v41 = vand.u32 4294901760, %v2473_v35 }
  0x6c   : > { %663 = vmatpush.msra.mxu3 %v662_v31  ;;  %584 = vmatpush.msra.mxu2 %v2475_v36  ;;  %v692_v31 = vand.u32 4294901760, %v691_v25 }
  0x6d   : > { %452 = vmatmul.f32.gmra.mxu2 %v2328_v16  ;;  %795 = vmatpush.msrb.mxu1 %v2470_v17  ;;  %v2481_v16 = vsub.f32 %v549_v33, %v2475_v36  ;;  %v673_v50 = vsub.f32 %v2473_v35, %v672_v41 }
  0x6e   : > { %669 = vmatpush.msra.mxu3 %v668_v32  ;;  %747 = vmatpush.msrb.mxu0 %v2473_v35  ;;  %v702_v32 = vand.u32 4294901760, %v701_v26 }
  0x6f   : > { %483 = vmatmul.f32.gmra.mxu3 %v383_v23  ;;  %v2483_v23 = vand.u32 4294901760, %v548_v40  ;;  %797 = vmatpush.msrb.mxu1 %v2475_v36  ;;  %v678_v54 = vand.u32 4294901760, %v2481_v16  ;;  %v674_v61 = vand.u32 4294901760, %v673_v50 }
  0x70   : > { %750 = vmatpush.msrb.mxu0 %v2481_v16  ;;  %v703_v33 = vsub.f32 %v701_v26, %v702_v32 }
  0x71   : > { %v2493_v55 = vsub.f32 %v548_v40, %v2483_v23  ;;  %586 = vmatpush.msra.mxu2 %v2483_v23  ;;  %799 = vmatpush.msrb.mxu1 %v2483_v23  ;;  %v679_v62 = vsub.f32 %v2481_v16, %v678_v54  ;;  %v698_v40 = vand.u32 4294901760, %v697_v13 }
  0x72   : > { %675 = vmatpush.msra.mxu3 %v674_v61  ;;  %v704_v16 = vand.u32 4294901760, %v703_v33 }
  0x73   : > { %v684_v63 = vand.u32 4294901760, %v2493_v55  ;;  %588 = vmatpush.msra.mxu2 %v2495_v56  ;;  %753 = vmatpush.msrb.mxu0 %v2493_v55  ;;  %v680_v10 = vand.u32 4294901760, %v679_v62 }
  0x74   : > { %801 = vmatpush.msrb.mxu1 %v2495_v56 }
  0x75   : > { %v685_v15 = vsub.f32 %v2493_v55, %v684_v63  ;;  %756 = vmatpush.msrb.mxu0 %v689_v6  ;;  %590 = vmatpush.msra.mxu2 %v2505_v5 }
  0x76   : > { %803 = vmatpush.msrb.mxu1 %v2505_v5  ;;  %681 = vmatpush.msra.mxu3 %v680_v10 }
  0x77   : > { %v686_v22 = vand.u32 4294901760, %v685_v15  ;;  %592 = vmatpush.msra.mxu2 %v591_v20  ;;  %759 = vmatpush.msrb.mxu0 %v695_v12  ;;  %v938_v12 = vld [vmem:[#allocation11 + $0x8] sm:$0xff] }
  0x78   : > { %805 = vmatpush.msrb.mxu1 %v591_v20 }
  0x79   : > { %687 = vmatpush.msra.mxu3 %v686_v22  ;;  %822 = vmatpush.msrb.mxu2 %v612_v42 }
  0x7a   : > { %762 = vmatpush.msrb.mxu0 %v701_v26 }
  0x7b   : > { %693 = vmatpush.msra.mxu3 %v692_v31  ;;  %826 = vmatpush.msrb.mxu2 %v618_v45 }
  0x7d   : > { %830 = vmatpush.msrb.mxu2 %v624_v46  ;;  %699 = vmatpush.msra.mxu3 %v698_v40 }
  0x7f   : > { %834 = vmatpush.msrb.mxu2 %v630_v47  ;;  %705 = vmatpush.msra.mxu3 %v704_v16 }
  0x81   : > { %893 = vmatpush.msrb.mxu3 %v2333_v24  ;;  %838 = vmatpush.msrb.mxu2 %v636_v57 }
  0x83   : > { %895 = vmatpush.msrb.mxu3 %v2338_v27  ;;  %842 = vmatpush.msrb.mxu2 %v642_v0 }
  0x85   : > { %897 = vmatpush.msrb.mxu3 %v2340_v28  ;;  %846 = vmatpush.msrb.mxu2 %v648_v7 }
  0x87   : > { %899 = vmatpush.msrb.mxu3 %v2342_v29  ;;  %850 = vmatpush.msrb.mxu2 %v654_v11 }
  0x89   : > { %901 = vmatpush.msrb.mxu3 %v2361_v43  ;;  %854 = vmatpush.msrb.mxu2 %v660_v19 }
  0x8b   : > { %903 = vmatpush.msrb.mxu3 %v2363_v44  ;;  %858 = vmatpush.msrb.mxu2 %v666_v21 }
  0x8d   : > { %905 = vmatpush.msrb.mxu3 %v2369_v48  ;;  %862 = vmatpush.msrb.mxu2 %v672_v41 }
  0x8f   : > { %907 = vmatpush.msrb.mxu3 %v2382_v53  ;;  %866 = vmatpush.msrb.mxu2 %v678_v54 }
  0x91   : > { %909 = vmatpush.msrb.mxu3 %v2397_v59  ;;  %870 = vmatpush.msrb.mxu2 %v684_v63 }
  0x93   : > { %911 = vmatpush.msrb.mxu3 %v2411_v4  ;;  %874 = vmatpush.msrb.mxu2 %v690_v18 }
  0x95   : > { %913 = vmatpush.msrb.mxu3 %v2470_v17  ;;  %878 = vmatpush.msrb.mxu2 %v696_v30 }
  0x97   : > { %915 = vmatpush.msrb.mxu3 %v2475_v36  ;;  %882 = vmatpush.msrb.mxu2 %v702_v32  ;;  %v943_v32 = vsel %vm348_vm0, %v938_v12, 0 }
  0x99   : > { %917 = vmatpush.msrb.mxu3 %v2483_v23 }
  0x9b   : > { %919 = vmatpush.msrb.mxu3 %v2495_v56 }
  0x9d   : > { %921 = vmatpush.msrb.mxu3 %v2505_v5  ;;  %v940_v5 = vsel %vm348_vm0, %v937_v60, 0 }
  0x9f   : > { %923 = vmatpush.msrb.mxu3 %v591_v20  ;;  %v2550_v20 = vand.u32 4294901760, %v940_v5 }
  0xa1   : > { %v2558_v31 = vsub.f32 %v940_v5, %v2550_v20 }
  0xcb   : > { %v538_v43 = vpop.f32.mrf.mxu1 }
  0xcf   : > { %v511_v38 = vpop.f32.mrf.mxu0 }
  0xd4   : > { %v542_v0 = vpop.f32.mrf.mxu1 }
  0xd7   : > { %v515_v57 = vpop.f32.mrf.mxu0 }
  0xd8   : > { %v379_v24 = vpop.f32.mrf.mxu2 }
  0xd9   : > { %v418_v27 = vpop.f32.mrf.mxu3 }
  0xda   : > { %v419_v34 = vadd.f32 %v418_v27, %v379_v24  ;;  %v2563_v24 = vand.u32 4294901760, %v943_v32 }
  0xe0   : > { %v387_v28 = vpop.f32.mrf.mxu2 }
  0xe2   : > { %v422_v29 = vpop.f32.mrf.mxu3 }
  0xe3   : > { %v423_v46 = vadd.f32 %v422_v29, %v387_v28 }
  0xe8   : > { %v448_v37 = vpop.f32.mrf.mxu2 }
  0xe9   : > { %v449_v39 = vadd.f32 %v448_v37, %v419_v34  ;;  %v2571_v34 = vsub.f32 %v943_v32, %v2563_v24 }
  0xea   : > { %v478_v42 = vpop.f32.mrf.mxu3 }
  0xeb   : > { %v479_v44 = vadd.f32 %v478_v42, %v449_v39 }
  0xed   : > { %v512_v45 = vadd.f32 %v511_v38, %v479_v44 }
  0xef   : > { %v539_v47 = vadd.f32 %v538_v43, %v512_v45  ;;  %v973_v43 = vand.u32 4294901760, %v2571_v34 }
  0xf0   : > { %v453_v48 = vpop.f32.mrf.mxu2 }
  0xf1   : > { %v593_v51 = vand.u32 4294901760, %v539_v47  ;;  %v454_v52 = vadd.f32 %v453_v48, %v423_v46  ;;  %v1150_v48 = vld [vmem:[#allocation13 + $0x78] sm:$0xff] }
  0xf2   : > { %v484_v53 = vpop.f32.mrf.mxu3 }
  0xf3   : > { %v594_v58 = vsub.f32 %v539_v47, %v593_v51  ;;  %v485_v59 = vadd.f32 %v484_v53, %v454_v52  ;;  %707 = vmatmul.f32.vlgmr.msra.gmra.mxu3 %v593_v51  ;;  %v974_v47 = vsub.f32 %v2571_v34, %v973_v43  ;;  %v1148_v52 = vld [vmem:[#allocation13 + $0x68] sm:$0xff] }
  0xf5   : > { %v516_v3 = vadd.f32 %v515_v57, %v485_v59  ;;  %765 = vmatmul.f32.vlgmr.msrb.gmra.mxu0 %v594_v58  ;;  %v595_v4 = vand.u32 4294901760, %v594_v58  ;;  %v2585_v57 = vand.u32 4294901760, %v1150_v48  ;;  %v2589_v59 = vand.u32 4294901760, %v1148_v52 }
  0xf7   : > { %v543_v7 = vadd.f32 %v542_v0, %v516_v3  ;;  %v596_v8 = vsub.f32 %v594_v58, %v595_v4  ;;  %809 = vmatmul.f32.vlgmr.msrb.gmra.mxu1 %v595_v4  ;;  %v1147_v0 = vld [vmem:[#allocation13 + $0x60] sm:$0xff]  ;;  %v1146_v3 = vld [vmem:[#allocation13 + $0x58] sm:$0xff]  ;;  %v1145_v4 = vld [vmem:[#allocation13 + $0x50] sm:$0xff] }
  0xf9   : > { %v601_v11 = vand.u32 4294901760, %v543_v7  ;;  %v597_v14 = vand.u32 4294901760, %v596_v8  ;;  %v2593_v8 = vand.u32 4294901760, %v1146_v3 }
  0xfb   : > { %v602_v19 = vsub.f32 %v543_v7, %v601_v11  ;;  %598 = vmatmul.f32.vlgmr.msra.gmra.mxu2 %v597_v14  ;;  %711 = vmatmul.f32.gmra.mxu3 %v601_v11  ;;  %v2591_v7 = vand.u32 4294901760, %v1147_v0  ;;  %v1144_v14 = vld [vmem:[#allocation13 + $0x48] sm:$0xff] }
  0xfc   : > { %v2619_v60 = vand.u32 4294901760, %v1144_v14 }
  0xfd   : > { %770 = vmatmul.f32.gmra.mxu0 %v602_v19  ;;  %v603_v21 = vand.u32 4294901760, %v602_v19 }
  0xfe   : > { %v2643_v12 = vsub.f32 %v1144_v14, %v2619_v60 }
  0xff   : > { %815 = vmatmul.f32.gmra.mxu1 %v603_v21  ;;  %v604_v17 = vsub.f32 %v602_v19, %v603_v21  ;;  %v2598_v21 = vsub.f32 %v1150_v48, %v2585_v57  ;;  %v1141_v48 = vld [vmem:[#allocation13 + $0x30] sm:$0xff] }
 0x101   : > { %v605_v35 = vand.u32 4294901760, %v604_v17 }
 0x103   : > { %606 = vmatmul.f32.gmra.mxu2 %v605_v35  ;;  %925 = vmatmul.f32.vlgmr.msrb.gmra.mxu3 %v593_v51  ;;  %v2604_v35 = vsub.f32 %v1148_v52, %v2589_v59 }
 0x10b   : > { %884 = vmatmul.f32.vlgmr.msrb.gmra.mxu2 %v593_v51  ;;  %929 = vmatmul.f32.gmra.mxu3 %v601_v11  ;;  %v1149_v51 = vld [vmem:[#allocation13 + $0x70] sm:$0xff] }
 0x10c   : > { %v2587_v58 = vand.u32 4294901760, %v1149_v51 }
 0x10e   : > { %v2601_v17 = vsub.f32 %v1149_v51, %v2587_v58  ;;  %v2705_v51 = vand.u32 4294901760, %v1141_v48 }
 0x113   : > { %888 = vmatmul.f32.gmra.mxu2 %v601_v11  ;;  %v2595_v11 = vand.u32 4294901760, %v1145_v4 }
 0x172   : > { %v766_v50 = vpop.f32.mrf.mxu0 }
 0x174   : > { %v810_v56 = vpop.f32.mrf.mxu1 }
 0x176   : > { %v708_v36 = vpop.f32.mrf.mxu3 }
 0x17a   : > { %v771_v10 = vpop.f32.mrf.mxu0 }
 0x17c   : > { %v816_v25 = vpop.f32.mrf.mxu1 }
 0x17e   : > { %v599_v41 = vpop.f32.mrf.mxu2  ;;  %v712_v23 = vpop.f32.mrf.mxu3 }
 0x17f   : > { %v709_v49 = vadd.f32 %v708_v36, %v599_v41  ;;  %v975_v41 = vand.u32 4294901760, %v974_v47 }
 0x181   : > { %v767_v55 = vadd.f32 %v766_v50, %v709_v49  ;;  %v2612_v49 = vsub.f32 %v1146_v3, %v2593_v8  ;;  %v1143_v50 = vld [vmem:[#allocation13 + $0x40] sm:$0xff] }
 0x183   : > { %v811_v62 = vadd.f32 %v810_v56, %v767_v55  ;;  %v1208_v55 = vand.u32 4294901760, %v2601_v17  ;;  %v1214_v56 = vand.u32 4294901760, %v2604_v35 }
 0x186   : > { %v607_v54 = vpop.f32.mrf.mxu2  ;;  %v926_v63 = vpop.f32.mrf.mxu3 }
 0x187   : > { %v713_v61 = vadd.f32 %v712_v23, %v607_v54  ;;  %v2609_v23 = vsub.f32 %v1147_v0, %v2591_v7  ;;  %v1202_v54 = vand.u32 4294901760, %v2598_v21 }
 0x189   : > { %v772_v15 = vadd.f32 %v771_v10, %v713_v61  ;;  %v2622_v61 = vsub.f32 %v1145_v4, %v2595_v11  ;;  %v1220_v5 = vand.u32 4294901760, %v2609_v23  ;;  %v1226_v10 = vand.u32 4294901760, %v2612_v49 }
 0x18b   : > { %v817_v30 = vadd.f32 %v816_v25, %v772_v15 }
 0x18e   : > { %v885_v6 = vpop.f32.mrf.mxu2  ;;  %v930_v40 = vpop.f32.mrf.mxu3 }
 0x18f   : > { %v886_v9 = vadd.f32 %v885_v6, %v811_v62  ;;  %v1142_v62 = vld [vmem:[#allocation13 + $0x38] sm:$0xff]  ;;  %v1209_v6 = vsub.f32 %v2601_v17, %v1208_v55 }
 0x190   : > { %v2645_v25 = vand.u32 4294901760, %v1142_v62 }
 0x191   : > { %v927_v18 = vadd.f32 %v926_v63, %v886_v9  ;;  %v1203_v63 = vsub.f32 %v2598_v21, %v1202_v54  ;;  %v2634_v9 = vand.u32 4294901760, %v1143_v50 }
 0x193   : > { %v2553_v22 = vsub.f32 %v2306_v2, %v927_v18  ;;  %v965_v2 = vand.u32 4294901760, %v2558_v31  ;;  %v1204_v15 = vand.u32 4294901760, %v1203_v63  ;;  %v1215_v18 = vsub.f32 %v2604_v35, %v1214_v56 }
 0x194   : > { %v2655_v32 = vsub.f32 %v1143_v50, %v2634_v9 }
 0x195   : > { %v935_v26 = vmul.f32 %v2553_v22, %v2553_v22  ;;  %v966_v38 = vsub.f32 %v2558_v31, %v965_v2 }
 0x196   : > { %v889_v13 = vpop.f32.mrf.mxu2 }
 0x197   : > { %v890_v33 = vadd.f32 %v889_v13, %v817_v30  ;;  %v2561_v16 = vand.u32 4294901760, %v935_v26  ;;  %v967_v44 = vand.u32 4294901760, %v966_v38  ;;  %v1232_v30 = vand.u32 4294901760, %v2622_v61 }
 0x198   : > { %v1216_v13 = vand.u32 4294901760, %v1215_v18  ;;  %v1136_v18 = vld [vmem:[#allocation13 + $0x8] sm:$0xff] }
 0x199   : > { %v931_v27 = vadd.f32 %v930_v40, %v890_v33  ;;  %v1001_v29 = vsub.f32 %v935_v26, %v2561_v16  ;;  %v1210_v26 = vand.u32 4294901760, %v1209_v6  ;;  %v1227_v33 = vsub.f32 %v2612_v49, %v1226_v10 }
 0x19a   : > { %v1238_v40 = vand.u32 4294901760, %v2643_v12 }
 0x19b   : > { %v2567_v28 = vsub.f32 %v2304_v1, %v931_v27  ;;  %v1002_v42 = vand.u32 4294901760, %v1001_v29  ;;  %v1228_v38 = vand.u32 4294901760, %v1227_v33  ;;  %v2751_v33 = vand.u32 4294901760, %v1136_v18 }
 0x19d   : > { %v936_v37 = vmul.f32 %v2567_v28, %v2567_v28  ;;  %v1003_v46 = vsub.f32 %v1001_v29, %v1002_v42 }
 0x19f   : > { %v959_v39 = vand.u32 4294901760, %v936_v37  ;;  %v1004_v36 = vand.u32 4294901760, %v1003_v46 }
 0x1a1   : > { %960 = vmatpush.msra.mxu0 %v959_v39  ;;  %1123 = vmatpush.msra.mxu3 %v959_v39  ;;  %v995_v1 = vsub.f32 %v936_v37, %v959_v39  ;;  %v1244_v37 = vand.u32 4294901760, %v2655_v32 }
 0x1a3   : > { %962 = vmatpush.msra.mxu0 %v2561_v16  ;;  %1125 = vmatpush.msra.mxu3 %v2561_v16  ;;  %v996_v45 = vand.u32 4294901760, %v995_v1 }
 0x1a4   : > { %1127 = vmatmul.f32.vlgmr.msra.gmra.mxu3 %v2550_v20  ;;  %968 = vmatmul.f32.vlgmr.msra.gmra.mxu0 %v967_v44 }
 0x1a5   : > { %1031 = vmatpush.msrb.mxu0 %v995_v1  ;;  %1094 = vmatpush.msra.mxu2 %v996_v45  ;;  %v997_v53 = vsub.f32 %v995_v1, %v996_v45 }
 0x1a6   : > { %1365 = vmatpush.msrb.mxu3 %v2585_v57 }
 0x1a7   : > { %1034 = vmatpush.msrb.mxu0 %v1001_v29  ;;  %1098 = vmatpush.msra.mxu2 %v1002_v42  ;;  %v998_v19 = vand.u32 4294901760, %v997_v53  ;;  %v1233_v29 = vsub.f32 %v2622_v61, %v1232_v30  ;;  %v1139_v53 = vld [vmem:[#allocation13 + $0x20] sm:$0xff] }
 0x1a8   : > { %1100 = vmatmul.f32.vlgmr.msra.gmra.mxu2 %v2550_v20  ;;  %1367 = vmatpush.msrb.mxu3 %v2587_v58 }
 0x1a9   : > { %1152 = vmatpush.msra.mxu0 %v2585_v57  ;;  %999 = vmatpush.msra.mxu1 %v998_v19  ;;  %v1234_v1 = vand.u32 4294901760, %v1233_v29  ;;  %v1135_v29 = vld [vmem:[#allocation13] sm:$0xff] }
 0x1aa   : > { %1307 = vmatpush.msrb.mxu2 %v2598_v21  ;;  %1369 = vmatpush.msrb.mxu3 %v2589_v59 }
 0x1ab   : > { %1154 = vmatpush.msra.mxu0 %v2587_v58  ;;  %1005 = vmatpush.msra.mxu1 %v1004_v36 }
 0x1ac   : > { %1007 = vmatmul.f32.vlgmr.msra.gmra.mxu1 %v2550_v20  ;;  %1131 = vmatmul.f32.gmra.mxu3 %v2563_v24  ;;  %v1221_v20 = vsub.f32 %v2609_v23, %v1220_v5 }
 0x1ad   : > { %1156 = vmatpush.msra.mxu0 %v2589_v59  ;;  %1061 = vmatpush.msrb.mxu1 %v959_v39  ;;  %v1239_v39 = vsub.f32 %v2643_v12, %v1238_v40 }
 0x1ae   : > { %976 = vmatmul.f32.gmra.mxu0 %v975_v41  ;;  %1310 = vmatpush.msrb.mxu2 %v2601_v17  ;;  %v1222_v27 = vand.u32 4294901760, %v1221_v20  ;;  %v1137_v41 = vld [vmem:[#allocation13 + $0x10] sm:$0xff] }
 0x1af   : > { %1158 = vmatpush.msra.mxu0 %v2591_v7  ;;  %1063 = vmatpush.msrb.mxu1 %v2561_v16  ;;  %v2665_v16 = vsub.f32 %v1142_v62, %v2645_v25  ;;  %v1240_v44 = vand.u32 4294901760, %v1239_v39 }
 0x1b0   : > { %1104 = vmatmul.f32.gmra.mxu2 %v2563_v24  ;;  %1371 = vmatpush.msrb.mxu3 %v2591_v7 }
 0x1b1   : > { %1205 = vmatpush.msra.mxu1 %v1204_v15  ;;  %1160 = vmatpush.msra.mxu0 %v2593_v8  ;;  %v1250_v42 = vand.u32 4294901760, %v2665_v16  ;;  %v2744_v15 = vand.u32 4294901760, %v1137_v41 }
 0x1b2   : > { %1313 = vmatpush.msrb.mxu2 %v2604_v35  ;;  %1373 = vmatpush.msrb.mxu3 %v2593_v8 }
 0x1b3   : > { %1211 = vmatpush.msra.mxu1 %v1210_v26  ;;  %1162 = vmatpush.msra.mxu0 %v2595_v11  ;;  %v1251_v45 = vsub.f32 %v2665_v16, %v1250_v42 }
 0x1b4   : > { %1316 = vmatpush.msrb.mxu2 %v2609_v23  ;;  %1011 = vmatmul.f32.gmra.mxu1 %v2563_v24  ;;  %v1245_v24 = vsub.f32 %v2655_v32, %v1244_v37 }
 0x1b5   : > { %1217 = vmatpush.msra.mxu1 %v1216_v13  ;;  %1164 = vmatpush.msra.mxu0 %v2619_v60  ;;  %v1252_v47 = vand.u32 4294901760, %v1251_v45 }
 0x1b6   : > { %1037 = vmatmul.f32.vlgmr.msrb.gmra.mxu0 %v2558_v31  ;;  %1319 = vmatpush.msrb.mxu2 %v2612_v49  ;;  %v1246_v46 = vand.u32 4294901760, %v1245_v24  ;;  %v1140_v31 = vld [vmem:[#allocation13 + $0x28] sm:$0xff]  ;;  %v1181_v24 = vand.u32 4294901760, %v1135_v29 }
 0x1b7   : > { %1223 = vmatpush.msra.mxu1 %v1222_v27  ;;  %1375 = vmatpush.msrb.mxu3 %v2595_v11  ;;  %v2710_v52 = vand.u32 4294901760, %v1140_v31  ;;  %v1279_v27 = vsub.f32 %v1137_v41, %v2744_v15 }
 0x1b8   : > { %1166 = vmatpush.msra.mxu0 %v2634_v9  ;;  %1322 = vmatpush.msrb.mxu2 %v2622_v61 }
 0x1b9   : > { %1229 = vmatpush.msra.mxu1 %v1228_v38  ;;  %1377 = vmatpush.msrb.mxu3 %v2619_v60  ;;  %v2716_v3 = vsub.f32 %v1140_v31, %v2710_v52 }
 0x1ba   : > { %1168 = vmatpush.msra.mxu0 %v2645_v25  ;;  %1325 = vmatpush.msrb.mxu2 %v2643_v12 }
 0x1bb   : > { %1235 = vmatpush.msra.mxu1 %v1234_v1  ;;  %1379 = vmatpush.msrb.mxu3 %v2634_v9  ;;  %v1262_v14 = vand.u32 4294901760, %v2716_v3  ;;  %v1285_v1 = vsub.f32 %v1136_v18, %v2751_v33 }
 0x1bc   : > { %1067 = vmatmul.f32.vlgmr.msrb.gmra.mxu1 %v965_v2  ;;  %1328 = vmatpush.msrb.mxu2 %v2655_v32  ;;  %v2708_v2 = vsub.f32 %v1141_v48, %v2705_v51 }
 0x1bd   : > { %1241 = vmatpush.msra.mxu1 %v1240_v44  ;;  %1381 = vmatpush.msrb.mxu3 %v2645_v25  ;;  %v1263_v62 = vsub.f32 %v2716_v3, %v1262_v14  ;;  %v1280_v44 = vand.u32 4294901760, %v1279_v27 }
 0x1be   : > { %1042 = vmatmul.f32.gmra.mxu0 %v2571_v34  ;;  %1331 = vmatpush.msrb.mxu2 %v2665_v16  ;;  %v1256_v0 = vand.u32 4294901760, %v2708_v2  ;;  %v2718_v34 = vand.u32 4294901760, %v1139_v53 }
 0x1bf   : > { %1247 = vmatpush.msra.mxu1 %v1246_v46  ;;  %1170 = vmatpush.msra.mxu0 %v2705_v51  ;;  %v1264_v26 = vand.u32 4294901760, %v1263_v62  ;;  %v1286_v46 = vand.u32 4294901760, %v1285_v1  ;;  %v1281_v48 = vsub.f32 %v1279_v27, %v1280_v44 }
 0x1c0   : > { %1383 = vmatpush.msrb.mxu3 %v2705_v51  ;;  %1334 = vmatpush.msrb.mxu2 %v2708_v2  ;;  %v1257_v4 = vsub.f32 %v2708_v2, %v1256_v0  ;;  %v2728_v19 = vsub.f32 %v1139_v53, %v2718_v34 }
 0x1c1   : > { %1253 = vmatpush.msra.mxu1 %v1252_v47  ;;  %1172 = vmatpush.msra.mxu0 %v2710_v52  ;;  %v1291_v47 = vsub.f32 %v1135_v29, %v1181_v24  ;;  %v1287_v31 = vsub.f32 %v1285_v1, %v1286_v46  ;;  %v1534_v29 = vstv %s2801_s9 }
 0x1c2   : > { %1385 = vmatpush.msrb.mxu3 %v2710_v52  ;;  %1337 = vmatpush.msrb.mxu2 %v2716_v3  ;;  %v1258_v50 = vand.u32 4294901760, %v1257_v4  ;;  %v1268_v63 = vand.u32 4294901760, %v2728_v19 }
 0x1c3   : > { %1174 = vmatpush.msra.mxu0 %v2718_v34  ;;  %v1292_v53 = vand.u32 4294901760, %v1291_v47  ;;  %v1288_v4 = vand.u32 4294901760, %v1287_v31 }
 0x1c4   : > { %1073 = vmatmul.f32.gmra.mxu1 %v973_v43  ;;  %v1138_v43 = vld [vmem:[#allocation13 + $0x18] sm:$0xff]  ;;  %1387 = vmatpush.msrb.mxu3 %v2718_v34  ;;  %v1269_v20 = vsub.f32 %v2728_v19, %v1268_v63 }
 0x1c5   : > { %v2730_v36 = vand.u32 4294901760, %v1138_v43  ;;  %1340 = vmatpush.msrb.mxu2 %v2728_v19  ;;  %1259 = vmatpush.msra.mxu1 %v1258_v50  ;;  %v1293_v41 = vsub.f32 %v1291_v47, %v1292_v53 }
 0x1c6   : > { %v1270_v38 = vand.u32 4294901760, %v1269_v20 }
 0x1c7   : > { %v2740_v6 = vsub.f32 %v1138_v43, %v2730_v36  ;;  %1176 = vmatpush.msra.mxu0 %v2730_v36  ;;  %1389 = vmatpush.msrb.mxu3 %v2730_v36  ;;  %v1282_v43 = vand.u32 4294901760, %v1281_v48  ;;  %v1294_v50 = vand.u32 4294901760, %v1293_v41 }
 0x1c8   : > { %1265 = vmatpush.msra.mxu1 %v1264_v26 }
 0x1c9   : > { %v1274_v13 = vand.u32 4294901760, %v2740_v6  ;;  %1343 = vmatpush.msrb.mxu2 %v2740_v6  ;;  %1178 = vmatpush.msra.mxu0 %v2744_v15 }
 0x1ca   : > { %1391 = vmatpush.msrb.mxu3 %v2744_v15  ;;  %1271 = vmatpush.msra.mxu1 %v1270_v38  ;;  %v1541_v38 = vld [vmem:[#allocation2] sm:$0xff] }
 0x1cb   : > { %v1275_v39 = vsub.f32 %v2740_v6, %v1274_v13  ;;  %1180 = vmatpush.msra.mxu0 %v2751_v33  ;;  %1346 = vmatpush.msrb.mxu2 %v1279_v27 }
 0x1cc   : > { %1393 = vmatpush.msrb.mxu3 %v2751_v33 }
 0x1cd   : > { %v1276_v45 = vand.u32 4294901760, %v1275_v39  ;;  %1182 = vmatpush.msra.mxu0 %v1181_v24  ;;  %1349 = vmatpush.msrb.mxu2 %v1285_v1 }
 0x1ce   : > { %1395 = vmatpush.msrb.mxu3 %v1181_v24 }
 0x1cf   : > { %1277 = vmatpush.msra.mxu1 %v1276_v45  ;;  %1412 = vmatpush.msrb.mxu0 %v1202_v54 }
 0x1d0   : > { %1352 = vmatpush.msrb.mxu2 %v1291_v47 }
 0x1d1   : > { %1416 = vmatpush.msrb.mxu0 %v1208_v55  ;;  %1283 = vmatpush.msra.mxu1 %v1282_v43 }
 0x1d3   : > { %1420 = vmatpush.msrb.mxu0 %v1214_v56  ;;  %1289 = vmatpush.msra.mxu1 %v1288_v4 }
 0x1d5   : > { %1424 = vmatpush.msrb.mxu0 %v1220_v5  ;;  %1295 = vmatpush.msra.mxu1 %v1294_v50 }
 0x1d7   : > { %1483 = vmatpush.msrb.mxu1 %v2585_v57  ;;  %1428 = vmatpush.msrb.mxu0 %v1226_v10 }
 0x1d9   : > { %1485 = vmatpush.msrb.mxu1 %v2587_v58  ;;  %1432 = vmatpush.msrb.mxu0 %v1232_v30 }
 0x1db   : > { %1487 = vmatpush.msrb.mxu1 %v2589_v59  ;;  %1436 = vmatpush.msrb.mxu0 %v1238_v40 }
 0x1dd   : > { %1489 = vmatpush.msrb.mxu1 %v2591_v7  ;;  %1440 = vmatpush.msrb.mxu0 %v1244_v37 }
 0x1df   : > { %1491 = vmatpush.msrb.mxu1 %v2593_v8  ;;  %1444 = vmatpush.msrb.mxu0 %v1250_v42 }
 0x1e1   : > { %1493 = vmatpush.msrb.mxu1 %v2595_v11  ;;  %1448 = vmatpush.msrb.mxu0 %v1256_v0 }
 0x1e3   : > { %1495 = vmatpush.msrb.mxu1 %v2619_v60  ;;  %1452 = vmatpush.msrb.mxu0 %v1262_v14 }
 0x1e5   : > { %1497 = vmatpush.msrb.mxu1 %v2634_v9  ;;  %1456 = vmatpush.msrb.mxu0 %v1268_v63 }
 0x1e7   : > { %1499 = vmatpush.msrb.mxu1 %v2645_v25  ;;  %1460 = vmatpush.msrb.mxu0 %v1274_v13 }
 0x1e9   : > { %1501 = vmatpush.msrb.mxu1 %v2705_v51  ;;  %1464 = vmatpush.msrb.mxu0 %v1280_v44  ;;  %v1532_v44 = vld [vmem:[#allocation15] sm:$0xff] }
 0x1eb   : > { %1503 = vmatpush.msrb.mxu1 %v2710_v52  ;;  %1468 = vmatpush.msrb.mxu0 %v1286_v46 }
 0x1ed   : > { %1505 = vmatpush.msrb.mxu1 %v2718_v34  ;;  %1472 = vmatpush.msrb.mxu0 %v1292_v53 }
 0x1ef   : > { %1507 = vmatpush.msrb.mxu1 %v2730_v36 }
 0x1f1   : > { %1509 = vmatpush.msrb.mxu1 %v2744_v15 }
 0x1f3   : > { %1511 = vmatpush.msrb.mxu1 %v2751_v33 }
 0x1f5   : > { %1513 = vmatpush.msrb.mxu1 %v1181_v24  ;;  %v1524_v24 = vld [vmem:[#allocation14] sm:$0xff] }
 0x221   : > { %v969_v57 = vpop.f32.mrf.mxu0 }
 0x227   : > { %v1128_v23 = vpop.f32.mrf.mxu3 }
 0x229   : > { %v1008_v58 = vpop.f32.mrf.mxu1 }
 0x22a   : > { %v1009_v11 = vadd.f32 %v1008_v58, %v969_v57  ;;  %v1542_v57 = vld [vmem:[#allocation2 + $0x8] sm:$0xff] }
 0x22b   : > { %v977_v59 = vpop.f32.mrf.mxu0  ;;  %v1101_v21 = vpop.f32.mrf.mxu2 }
 0x22f   : > { %v1132_v30 = vpop.f32.mrf.mxu3 }
 0x231   : > { %v1012_v7 = vpop.f32.mrf.mxu1 }
 0x232   : > { %v1013_v56 = vadd.f32 %v1012_v7, %v977_v59  ;;  %v1525_v59 = vld [vmem:[#allocation14 + $0x8] sm:$0xff]  ;;  %v1533_v7 = vld [vmem:[#allocation15 + $0x8] sm:$0xff] }
 0x233   : > { %v1038_v8 = vpop.f32.mrf.mxu0  ;;  %v1105_v10 = vpop.f32.mrf.mxu2 }
 0x234   : > { %v1039_v17 = vadd.f32 %v1038_v8, %v1009_v11 }
 0x239   : > { %v1068_v35 = vpop.f32.mrf.mxu1 }
 0x23a   : > { %v1069_v49 = vadd.f32 %v1068_v35, %v1039_v17 }
 0x23b   : > { %v1043_v55 = vpop.f32.mrf.mxu0 }
 0x23c   : > { %v1102_v54 = vadd.f32 %v1101_v21, %v1069_v49  ;;  %v1044_v5 = vadd.f32 %v1043_v55, %v1013_v56 }
 0x23e   : > { %v1129_v60 = vadd.f32 %v1128_v23, %v1102_v54 }
 0x240   : > { %v1183_v61 = vand.u32 4294901760, %v1129_v60 }
 0x241   : > { %v1074_v9 = vpop.f32.mrf.mxu1 }
 0x242   : > { %v1184_v12 = vsub.f32 %v1129_v60, %v1183_v61  ;;  %v1075_v25 = vadd.f32 %v1074_v9, %v1044_v5  ;;  %1297 = vmatmul.f32.vlgmr.msra.gmra.mxu1 %v1183_v61 }
 0x244   : > { %v1185_v32 = vand.u32 4294901760, %v1184_v12  ;;  %v1106_v40 = vadd.f32 %v1105_v10, %v1075_v25  ;;  %1355 = vmatmul.f32.vlgmr.msrb.gmra.mxu2 %v1184_v12 }
 0x246   : > { %v1186_v16 = vsub.f32 %v1184_v12, %v1185_v32  ;;  %v1133_v37 = vadd.f32 %v1132_v30, %v1106_v40  ;;  %1399 = vmatmul.f32.vlgmr.msrb.gmra.mxu3 %v1185_v32 }
 0x248   : > { %v1191_v42 = vand.u32 4294901760, %v1133_v37  ;;  %v1187_v51 = vand.u32 4294901760, %v1186_v16 }
 0x24a   : > { %v1192_v2 = vsub.f32 %v1133_v37, %v1191_v42  ;;  %1188 = vmatmul.f32.vlgmr.msra.gmra.mxu0 %v1187_v51  ;;  %1301 = vmatmul.f32.gmra.mxu1 %v1191_v42 }
 0x24c   : > { %1360 = vmatmul.f32.gmra.mxu2 %v1192_v2  ;;  %v1193_v52 = vand.u32 4294901760, %v1192_v2 }
 0x24e   : > { %1405 = vmatmul.f32.gmra.mxu3 %v1193_v52  ;;  %v1194_v0 = vsub.f32 %v1192_v2, %v1193_v52 }
 0x250   : > { %v1195_v3 = vand.u32 4294901760, %v1194_v0 }
 0x252   : > { %1196 = vmatmul.f32.gmra.mxu0 %v1195_v3  ;;  %1515 = vmatmul.f32.vlgmr.msrb.gmra.mxu1 %v1183_v61 }
 0x25a   : > { %1474 = vmatmul.f32.vlgmr.msrb.gmra.mxu0 %v1183_v61  ;;  %1519 = vmatmul.f32.gmra.mxu1 %v1191_v42 }
 0x262   : > { %1478 = vmatmul.f32.gmra.mxu0 %v1191_v42 }
 0x2bf   : > { %v1298_v34 = vpop.f32.mrf.mxu1 }
 0x2c7   : > { %v1189_v14 = vpop.f32.mrf.mxu0  ;;  %v1302_v19 = vpop.f32.mrf.mxu1 }
 0x2c8   : > { %v1299_v36 = vadd.f32 %v1298_v34, %v1189_v14  ;;  %v1356_v62 = vpop.f32.mrf.mxu2 }
 0x2c9   : > { %v1400_v15 = vpop.f32.mrf.mxu3 }
 0x2ca   : > { %v1357_v6 = vadd.f32 %v1356_v62, %v1299_v36 }
 0x2cc   : > { %v1401_v18 = vadd.f32 %v1400_v15, %v1357_v6 }
 0x2cf   : > { %v1197_v63 = vpop.f32.mrf.mxu0  ;;  %v1516_v20 = vpop.f32.mrf.mxu1 }
 0x2d0   : > { %v1303_v26 = vadd.f32 %v1302_v19, %v1197_v63  ;;  %v1361_v27 = vpop.f32.mrf.mxu2 }
 0x2d1   : > { %v1406_v48 = vpop.f32.mrf.mxu3 }
 0x2d2   : > { %v1362_v39 = vadd.f32 %v1361_v27, %v1303_v26 }
 0x2d4   : > { %v1407_v31 = vadd.f32 %v1406_v48, %v1362_v39 }
 0x2d7   : > { %v1475_v13 = vpop.f32.mrf.mxu0  ;;  %v1520_v50 = vpop.f32.mrf.mxu1 }
 0x2d8   : > { %v1476_v33 = vadd.f32 %v1475_v13, %v1401_v18 }
 0x2da   : > { %v1517_v1 = vadd.f32 %v1516_v20, %v1476_v33 }
 0x2dc   : > { %v1526_v45 = vmul.f32 %v1517_v1, %v2553_v22  ;;  %v1535_v46 = vmul.f32 %v1534_v29, %v1517_v1  ;;  %v1543_v47 = vadd.f32 %v1541_v38, %v1517_v1 }
 0x2de   : > { %v1528_v53 = vadd.f32 %v1526_v45, %v1524_v24  ;;  %v1537_v43 = vadd.f32 %v1535_v46, %v1532_v44  ;;  %1545 = vst [vmem:[#allocation2] sm:$0xff] %v1543_v47 }
 0x2df   : > { %v1479_v4 = vpop.f32.mrf.mxu0 }
 0x2e0   : > { %1530 = vst [vmem:[#allocation14] sm:$0xff] %v1528_v53  ;;  %v1480_v41 = vadd.f32 %v1479_v4, %v1407_v31 }
 0x2e1   : > { %1539 = vst [vmem:[#allocation15] sm:$0xff] %v1537_v43 }
 0x2e2   : > { %v1521_v58 = vadd.f32 %v1520_v50, %v1480_v41 }
 0x2e4   : > { %v1527_v8 = vmul.f32 %v1521_v58, %v2567_v28  ;;  %v1536_v11 = vmul.f32 %v1534_v29, %v1521_v58  ;;  %v1544_v22 = vadd.f32 %v1542_v57, %v1521_v58 }
 0x2e5   : > { %1550 = sbr.rel (%p1737_p1) target bundleno = 771 (0x303), region = 68 }
 0x2e6   : > { %v1529_v21 = vadd.f32 %v1527_v8, %v1525_v59  ;;  %v1538_v17 = vadd.f32 %v1536_v11, %v1533_v7  ;;  %1546 = vst [vmem:[#allocation2 + $0x8] sm:$0xff] %v1544_v22 }
 0x2e8   : > { %1531 = vst [vmem:[#allocation14 + $0x8] sm:$0xff] %v1529_v21 }
 0x2e9   : > { %1540 = vst [vmem:[#allocation15 + $0x8] sm:$0xff] %v1538_v17 }
 0x2ea   : > { %v1551_v35 = vld [vmem:[#allocation2] sm:$0xff]  ;;  %v1583_v16 = vld [vmem:[#allocation14] sm:$0xff] }
 0x2eb   : > { %1845 = vrcp.f32 %v1551_v35  ;;  %vm1558_vm1 = vweird.f32 %v1551_v35  ;;  %v1564_v56 = vand.u32 2147483648, %v1551_v35  ;;  %v1562_v61 = vand.u32 2147483647, %v1551_v35  ;;  %v1589_v42 = vld [vmem:[#allocation15] sm:$0xff] }
 0x2ed   : > { %v1552_v23 = vld [vmem:[#allocation2 + $0x8] sm:$0xff]  ;;  %v1565_v25 = vor.u32 1.1754944e-38, %v1564_v56  ;;  %vm1563_vm6 = vcmp.eq.f32.partialorder %v1562_v61, 8.507059e+37 }
 0x2ee   : > { %1847 = vrcp.f32 %v1552_v23  ;;  %v1579_v5 = vand.u32 2147483648, %v1552_v23  ;;  %vm1573_vm3 = vweird.f32 %v1552_v23  ;;  %v1577_v10 = vand.u32 2147483647, %v1552_v23 }
 0x2ef   : > { %v1584_v2 = vld [vmem:[#allocation14 + $0x8] sm:$0xff] }
 0x2f0   : > { %v1580_v40 = vor.u32 1.1754944e-38, %v1579_v5  ;;  %vm1578_vm8 = vcmp.eq.f32.partialorder %v1577_v10, 8.507059e+37  ;;  %v1590_v52 = vld [vmem:[#allocation15 + $0x8] sm:$0xff] }
 0x2f1   : > { %v1846_v49 = vpop.eup %1845 }
 0x2f2   : > { %v1554_v55 = vmul.f32 %v1846_v49, %v1551_v35  ;;  %vm1559_vm2 = vweird.f32 %v1846_v49 }
 0x2f3   : > { %vm1560_vm5 = vmor %vm1558_vm1, %vm1559_vm2 }
 0x2f4   : > { %v1848_v54 = vpop.eup %1847  ;;  %v1555_v60 = vsub.f32 1.0, %v1554_v55 }
 0x2f5   : > { %v1569_v28 = vmul.f32 %v1848_v54, %v1552_v23  ;;  %vm1574_vm4 = vweird.f32 %v1848_v54 }
 0x2f6   : > { %v1556_v12 = vmul.f32 %v1846_v49, %v1555_v60  ;;  %vm1575_vm7 = vmor %vm1573_vm3, %vm1574_vm4 }
 0x2f7   : > { %v1570_v9 = vsub.f32 1.0, %v1569_v28 }
 0x2f8   : > { %v1557_v32 = vadd.f32 %v1846_v49, %v1556_v12 }
 0x2f9   : > { %v1571_v30 = vmul.f32 %v1848_v54, %v1570_v9 }
 0x2fa   : > { %v1561_v51 = vsel %vm1560_vm5, %v1846_v49, %v1557_v32 }
 0x2fb   : > { %v1572_v37 = vadd.f32 %v1848_v54, %v1571_v30  ;;  %v1566_v0 = vsel %vm1563_vm6, %v1565_v25, %v1561_v51 }
 0x2fc   : > { %v1585_v34 = vmul.f32 %v1583_v16, %v1566_v0  ;;  %v1591_v19 = vmul.f32 %v1589_v42, %v1566_v0 }
 0x2fd   : > { %v1576_v3 = vsel %vm1575_vm7, %v1848_v54, %v1572_v37 }
 0x2fe   : > { %v1581_v14 = vsel %vm1578_vm8, %v1580_v40, %v1576_v3  ;;  %1587 = vst [vmem:[#allocation14] sm:$0xff] %v1585_v34 }
 0x2ff   : > { %v1586_v36 = vmul.f32 %v1584_v2, %v1581_v14  ;;  %v1592_v62 = vmul.f32 %v1590_v52, %v1581_v14  ;;  %1593 = vst [vmem:[#allocation15] sm:$0xff] %v1591_v19 }
 0x301   : > { %1588 = vst [vmem:[#allocation14 + $0x8] sm:$0xff] %v1586_v36 }
 0x302   : > { %1594 = vst [vmem:[#allocation15 + $0x8] sm:$0xff] %v1592_v62 }
 0x303 PF: > { %p1797_p4 = scmp.eq.s32.totalorder %s2195_s0, 3  ;;  %s2129_s13 = smov [#allocation14]  }
 0x304   : > { %s1600_s20 = sshll.u32 %s2129_s13, 4  ;;  %s1602_s11 = sshll.u32 %s2845_s6, 4  ;;  %s1601_s20 = int_to_ptr.vmem [resolvable:$true] %s1600_s20  ;;  %s1603_s11 = int_to_ptr.hbm [resolvable:$true] %s1602_s11 }
 0x305   : > { %s2130_s12 = smov 128   ;;  %s2131_s14 = smov 8  }
 0x306   : > { %1764 = dma.vmem_to_hbm [thread:$0]  (%p1797_p4), %s1601_s20, 256, %s1603_s11, [#allocation7], %s2130_s12, %s2130_s12, %s2131_s14  }
 0x307   : > { %s1616_s8 = sshll.u32 %s2846_s7, 4  ;;  %s2132_s19 = smov [#allocation15]   ;;  %s1617_s8 = int_to_ptr.hbm [resolvable:$true] %s1616_s8 }
 0x308   : > { %s1614_s24 = sshll.u32 %s2132_s19, 4  ;;  %s1615_s24 = int_to_ptr.vmem [resolvable:$true] %s1614_s24 }
 0x309   : > { %1766 = dma.vmem_to_hbm [thread:$0]  (%p1797_p4), %s1615_s24, 256, %s1617_s8, [#allocation16], %s2130_s12, %s2130_s12, %s2131_s14  }
 0x30a   : > { %2098 = dma.done.wait (%p1797_p4), [#allocation7], 256  }
 0x30b   : > { %2100 = vsyncadd (%p1797_p4), [#allocation7], 4294967040 }
 0x30c   : > { %2102 = dma.done.wait (%p1797_p4), [#allocation16], 256  }
 0x30d   : > { %2104 = vsyncadd (%p1797_p4), [#allocation16], 4294967040 }
 0x30e PF: > { %p30_p5 = scmp.ge.s32.totalorder %s2253_s17, 6   ;;  %s2851_s28 = smov %s2111_s29 }
 0x30f   : > { %s2852_s29 = smov %s2115_s30  ;;  %s2853_s30 = smov %s2263_s23 }
 0x310   : > { %s2854_s8 = smov %s2253_s17  ;;  %32 = sbr.rel (!%p30_p5) target bundleno = 13 (0xd), region = 109 }
 0x315   :  { %1638 = vsyncpa [#allocation6], 1 }
 0x316   :  { %1640 = vsyncpa [#allocation6 + $0x1], 1 }
 0x317   :  { %1641 = vsyncpa [#allocation9], 1 }
 0x318   :  { %1642 = vsyncpa [#allocation12], 1 }
 0x319   :  { %1643 = vsyncpa [#allocation7], 1 }
 0x31a   :  { %1645 = vsyncpa [#allocation7 + $0x1], 1 }
 0x31b   :  { %1646 = vsyncpa [#allocation16], 1 }

</bundles_post_ra>
